<compile_context>
chip_gen: v5e
topology: v5e:2x2
jax: 0.10.0
libtpu: 0.0.40
codegen_flags: <defaults>
</compile_context>

<pallas_src>
import functools

import jax
import jax.numpy as jnp
from jax.experimental import pallas as pl
from jax.experimental.pallas import tpu as pltpu


def _l3sy_kernel(x_ref, w_ref, b_ref, o_ref, *, H, W, K, pad, Cin_p, Cout):
    """One batch element per grid step.

    x_ref : (1, Cin_p, H*W + 2*halo)  flat, channel-padded, halo-padded input
    w_ref : (Cout, K*K*Cin_p)         conv taps, column = (kh*K + kw)*Cin_p + ci
    b_ref : (Cout, 1)                 bias
    o_ref : (1, Cout, H*W)            conv + ELU output (lane-dense)
    """
    HW = H * W
    halo = pad * W + pad

    xf = x_ref[0]                                        # (Cin_p, HW + 2*halo)

    # Column index of each output pixel (compile-time constant pattern).
    lane = jax.lax.broadcasted_iota(jnp.int32, (Cin_p, HW), 1)
    if (W & (W - 1)) == 0:
        col = jnp.bitwise_and(lane, W - 1)
    else:
        col = lane % W

    # im2col: one (Cin_p, HW) shifted slab per tap, left/right edges masked to zero
    # (top/bottom edges fall into the flat zero halo automatically).
    chunks = []
    for kh in range(K):
        for kw in range(K):
            shift = (kh - pad) * W + (kw - pad)
            patch = xf[:, halo + shift: halo + shift + HW]      # (Cin_p, HW)
            dc = kw - pad
            if dc != 0:
                valid = (col >= -dc) & (col < W - dc)
                patch = jnp.where(valid, patch, 0.0)
            chunks.append(patch)
    patches = jnp.concatenate(chunks, axis=0)            # (K*K*Cin_p, HW)

    # Single MXU matmul: (Cout, K*K*Cin_p) @ (K*K*Cin_p, HW) -> (Cout, HW)
    acc = jnp.dot(w_ref[...], patches, preferred_element_type=jnp.float32)
    acc = acc + b_ref[...]                               # (Cout, 1) broadcast

    # ELU (alpha = 1.0); clamp exp arg so the untaken branch stays finite.
    y = jnp.where(acc > 0.0, acc, jnp.exp(jnp.minimum(acc, 0.0)) - 1.0)
    o_ref[0] = y.astype(o_ref.dtype)


def l3sy_forward(x1, x2, w, b, *, kernel_size=3):
    """x1: (N, 4*bw, H, W), x2: (N, 3*bw, H, W) NCHW.  Returns (N, 4*bw, 2H, 2W)."""
    K = kernel_size
    pad = K // 2
    N, C1, H, W = x1.shape
    C2 = x2.shape[1]
    Cin = C1 + C2
    Cout = w.shape[0]
    assert w.shape == (Cout, Cin, K, K)

    Cin_p = ((Cin + 7) // 8) * 8          # sublane-align channels (14 -> 16)
    HW = H * W
    halo = pad * W + pad                  # flat halo covers +-pad rows and cols
    L = HW + 2 * halo
    KKC = K * K * Cin_p
    dtype = x1.dtype

    # ---- input layout glue (cheap, fuses in XLA; no transposes) ----
    x = jnp.concatenate([x1, x2], axis=1)                        # (N, Cin, H, W)
    if Cin_p != Cin:
        x = jnp.pad(x, ((0, 0), (0, Cin_p - Cin), (0, 0), (0, 0)))
    xflat = x.reshape(N, Cin_p, HW)                              # row-major: free
    xflat = jnp.pad(xflat, ((0, 0), (0, 0), (halo, halo)))       # (N, Cin_p, L)

    # Weights: (Cout, Cin, kh, kw) -> (Cout, (kh*K + kw)*Cin_p + ci), zero-padded ci.
    w_p = jnp.zeros((Cout, Cin_p, K, K), dtype=w.dtype).at[:, :Cin].set(w)
    w2d = jnp.transpose(w_p, (0, 2, 3, 1)).reshape(Cout, KKC)
    b2 = b.reshape(Cout, 1).astype(jnp.float32)

    kernel = functools.partial(_l3sy_kernel, H=H, W=W, K=K, pad=pad,
                               Cin_p=Cin_p, Cout=Cout)

    yflat = pl.pallas_call(
        kernel,
        out_shape=jax.ShapeDtypeStruct((N, Cout, HW), dtype),
        grid=(N,),
        in_specs=[
            pl.BlockSpec((1, Cin_p, L), lambda n: (n, 0, 0)),
            pl.BlockSpec((Cout, KKC), lambda n: (0, 0)),
            pl.BlockSpec((Cout, 1), lambda n: (0, 0)),
        ],
        out_specs=pl.BlockSpec((1, Cout, HW), lambda n: (n, 0, 0)),
        compiler_params=pltpu.CompilerParams(dimension_semantics=("parallel",)),
    )(xflat, w2d, b2)

    # ---- output layout glue: nearest x2 upsample as a fused broadcast/reshape ----
    y = yflat.reshape(N, Cout, H, W)
    out = jnp.broadcast_to(y[:, :, :, None, :, None], (N, Cout, H, 2, W, 2))
    return out.reshape(N, Cout, 2 * H, 2 * W)


def l3sy_reference(x1, x2, w, b):
    """Pure-JAX reference mirroring the PyTorch forward (NCHW)."""
    x = jnp.concatenate([x1, x2], axis=1)
    y = jax.lax.conv_general_dilated(
        x, w, window_strides=(1, 1), padding="SAME",
        dimension_numbers=("NCHW", "OIHW", "NCHW"))
    y = y + b[None, :, None, None]
    y = jnp.where(y > 0.0, y, jnp.exp(jnp.minimum(y, 0.0)) - 1.0)   # ELU(alpha=1)
    y = jnp.repeat(jnp.repeat(y, 2, axis=2), 2, axis=3)             # nearest x2
    return y


if __name__ == "__main__":
    base_width = 2
    N, H, W = 2, 16, 16
    K = 3
    Cin = (4 + 3) * base_width       # 14
    Cout = 4 * base_width            # 8

    key = jax.random.PRNGKey(0)
    k1, k2, k3, k4 = jax.random.split(key, 4)
    # The two forward inputs: 4*base_width and 3*base_width channels.
    x1 = jax.random.normal(k1, (N, 4 * base_width, H, W), jnp.float32)
    x2 = jax.random.normal(k2, (N, 3 * base_width, H, W), jnp.float32)
    # Deterministic synthetic conv parameters (shapes from Conv2d(Cin, Cout, 3)).
    w = jax.random.normal(k3, (Cout, Cin, K, K), jnp.float32) * 0.1
    b = jax.random.normal(k4, (Cout,), jnp.float32) * 0.1

    out = l3sy_forward(x1, x2, w, b, kernel_size=K)
    out = jax.block_until_ready(out)

    ref = l3sy_reference(x1, x2, w, b)
    assert out.shape == (N, Cout, 2 * H, 2 * W), out.shape
    assert jnp.allclose(out, ref, atol=1e-4, rtol=1e-4), (
        float(jnp.max(jnp.abs(out - ref))))
    print("KERNEL_OK")
</pallas_src>

<mosaic_0001>
module attributes {stable_mosaic.version = 11 : i64} {
  func.func @_l3sy_kernel(%arg0: i32, %arg1: memref<1x16x290xf32, #tpu.memory_space<vmem>>, %arg2: memref<8x144xf32, #tpu.memory_space<vmem>>, %arg3: memref<8x1xf32, #tpu.memory_space<vmem>>, %arg4: memref<1x8x256xf32, #tpu.memory_space<vmem>>) attributes {dimension_semantics = [#tpu.dimension_semantics<parallel>], iteration_bounds = array<i64: 2>, scalar_prefetch = 0 : i64, scratch_operands = 0 : i64, tpu.core_type = #tpu.core_type<tc>, window_params = [{transform_indices = @transform_0, window_bounds = array<i64: 1, 16, 290>}, {pipeline_mode = #tpu.pipeline_mode<synchronous>, transform_indices = @transform_1, window_bounds = array<i64: 8, 144>}, {pipeline_mode = #tpu.pipeline_mode<synchronous>, transform_indices = @transform_2, window_bounds = array<i64: 8, 1>}, {transform_indices = @transform_3, window_bounds = array<i64: 1, 8, 256>}]} {
    %c0 = arith.constant 0 : index
    %c0_0 = arith.constant 0 : index
    %c0_1 = arith.constant 0 : index
    %0 = vector.load %arg1[%c0, %c0_0, %c0_1] : memref<1x16x290xf32, #tpu.memory_space<vmem>>, vector<1x16x290xf32>
    %1 = vector.shape_cast %0 : vector<1x16x290xf32> to vector<16x290xf32>
    %2 = tpu.iota {dimensions = array<i32: 1>} : vector<16x256xi32>
    %c15_i32 = arith.constant 15 : i32
    %3 = vector.broadcast %c15_i32 : i32 to vector<16x256xi32>
    %4 = arith.andi %2, %3 : vector<16x256xi32>
    %5 = vector.extract_strided_slice %1 {offsets = [0, 0], sizes = [16, 256], strides = [1, 1]} : vector<16x290xf32> to vector<16x256xf32>
    %c1_i32 = arith.constant 1 : i32
    %6 = vector.broadcast %c1_i32 : i32 to vector<16x256xi32>
    %7 = arith.cmpi sge, %4, %6 : vector<16x256xi32>
    %c17_i32 = arith.constant 17 : i32
    %8 = vector.broadcast %c17_i32 : i32 to vector<16x256xi32>
    %9 = arith.cmpi slt, %4, %8 : vector<16x256xi32>
    %10 = arith.andi %7, %9 : vector<16x256xi1>
    %cst = arith.constant 0.000000e+00 : f32
    %11 = vector.broadcast %cst : f32 to vector<16x256xf32>
    %12 = arith.select %10, %5, %11 : vector<16x256xi1>, vector<16x256xf32>
    %13 = vector.extract_strided_slice %1 {offsets = [0, 1], sizes = [16, 256], strides = [1, 1]} : vector<16x290xf32> to vector<16x256xf32>
    %14 = vector.extract_strided_slice %1 {offsets = [0, 2], sizes = [16, 256], strides = [1, 1]} : vector<16x290xf32> to vector<16x256xf32>
    %c-1_i32 = arith.constant -1 : i32
    %15 = vector.broadcast %c-1_i32 : i32 to vector<16x256xi32>
    %16 = arith.cmpi sge, %4, %15 : vector<16x256xi32>
    %c15_i32_2 = arith.constant 15 : i32
    %17 = vector.broadcast %c15_i32_2 : i32 to vector<16x256xi32>
    %18 = arith.cmpi slt, %4, %17 : vector<16x256xi32>
    %19 = arith.andi %16, %18 : vector<16x256xi1>
    %cst_3 = arith.constant 0.000000e+00 : f32
    %20 = vector.broadcast %cst_3 : f32 to vector<16x256xf32>
    %21 = arith.select %19, %14, %20 : vector<16x256xi1>, vector<16x256xf32>
    %22 = vector.extract_strided_slice %1 {offsets = [0, 16], sizes = [16, 256], strides = [1, 1]} : vector<16x290xf32> to vector<16x256xf32>
    %c1_i32_4 = arith.constant 1 : i32
    %23 = vector.broadcast %c1_i32_4 : i32 to vector<16x256xi32>
    %24 = arith.cmpi sge, %4, %23 : vector<16x256xi32>
    %c17_i32_5 = arith.constant 17 : i32
    %25 = vector.broadcast %c17_i32_5 : i32 to vector<16x256xi32>
    %26 = arith.cmpi slt, %4, %25 : vector<16x256xi32>
    %27 = arith.andi %24, %26 : vector<16x256xi1>
    %cst_6 = arith.constant 0.000000e+00 : f32
    %28 = vector.broadcast %cst_6 : f32 to vector<16x256xf32>
    %29 = arith.select %27, %22, %28 : vector<16x256xi1>, vector<16x256xf32>
    %30 = vector.extract_strided_slice %1 {offsets = [0, 17], sizes = [16, 256], strides = [1, 1]} : vector<16x290xf32> to vector<16x256xf32>
    %31 = vector.extract_strided_slice %1 {offsets = [0, 18], sizes = [16, 256], strides = [1, 1]} : vector<16x290xf32> to vector<16x256xf32>
    %c-1_i32_7 = arith.constant -1 : i32
    %32 = vector.broadcast %c-1_i32_7 : i32 to vector<16x256xi32>
    %33 = arith.cmpi sge, %4, %32 : vector<16x256xi32>
    %c15_i32_8 = arith.constant 15 : i32
    %34 = vector.broadcast %c15_i32_8 : i32 to vector<16x256xi32>
    %35 = arith.cmpi slt, %4, %34 : vector<16x256xi32>
    %36 = arith.andi %33, %35 : vector<16x256xi1>
    %cst_9 = arith.constant 0.000000e+00 : f32
    %37 = vector.broadcast %cst_9 : f32 to vector<16x256xf32>
    %38 = arith.select %36, %31, %37 : vector<16x256xi1>, vector<16x256xf32>
    %39 = vector.extract_strided_slice %1 {offsets = [0, 32], sizes = [16, 256], strides = [1, 1]} : vector<16x290xf32> to vector<16x256xf32>
    %c1_i32_10 = arith.constant 1 : i32
    %40 = vector.broadcast %c1_i32_10 : i32 to vector<16x256xi32>
    %41 = arith.cmpi sge, %4, %40 : vector<16x256xi32>
    %c17_i32_11 = arith.constant 17 : i32
    %42 = vector.broadcast %c17_i32_11 : i32 to vector<16x256xi32>
    %43 = arith.cmpi slt, %4, %42 : vector<16x256xi32>
    %44 = arith.andi %41, %43 : vector<16x256xi1>
    %cst_12 = arith.constant 0.000000e+00 : f32
    %45 = vector.broadcast %cst_12 : f32 to vector<16x256xf32>
    %46 = arith.select %44, %39, %45 : vector<16x256xi1>, vector<16x256xf32>
    %47 = vector.extract_strided_slice %1 {offsets = [0, 33], sizes = [16, 256], strides = [1, 1]} : vector<16x290xf32> to vector<16x256xf32>
    %48 = vector.extract_strided_slice %1 {offsets = [0, 34], sizes = [16, 256], strides = [1, 1]} : vector<16x290xf32> to vector<16x256xf32>
    %c-1_i32_13 = arith.constant -1 : i32
    %49 = vector.broadcast %c-1_i32_13 : i32 to vector<16x256xi32>
    %50 = arith.cmpi sge, %4, %49 : vector<16x256xi32>
    %c15_i32_14 = arith.constant 15 : i32
    %51 = vector.broadcast %c15_i32_14 : i32 to vector<16x256xi32>
    %52 = arith.cmpi slt, %4, %51 : vector<16x256xi32>
    %53 = arith.andi %50, %52 : vector<16x256xi1>
    %cst_15 = arith.constant 0.000000e+00 : f32
    %54 = vector.broadcast %cst_15 : f32 to vector<16x256xf32>
    %55 = arith.select %53, %48, %54 : vector<16x256xi1>, vector<16x256xf32>
    %56 = tpu.concatenate %12, %13, %21, %29, %30, %38, %46, %47, %55 in 0 : vector<16x256xf32>, vector<16x256xf32>, vector<16x256xf32>, vector<16x256xf32>, vector<16x256xf32>, vector<16x256xf32>, vector<16x256xf32>, vector<16x256xf32>, vector<16x256xf32> -> vector<144x256xf32>
    %c0_16 = arith.constant 0 : index
    %c0_17 = arith.constant 0 : index
    %57 = vector.load %arg2[%c0_16, %c0_17] : memref<8x144xf32, #tpu.memory_space<vmem>>, vector<8x144xf32>
    %cst_18 = arith.constant dense<0.000000e+00> : vector<8x256xf32>
    %58 = tpu.matmul %57, %56, %cst_18 {dimension_numbers = #tpu.dot_dimension_numbers<[1], [0], [0], [1], [0, 0, 1, 1], [], []>} : vector<8x144xf32>, vector<144x256xf32>, vector<8x256xf32> -> vector<8x256xf32>
    %c0_19 = arith.constant 0 : index
    %c0_20 = arith.constant 0 : index
    %59 = vector.load %arg3[%c0_19, %c0_20] : memref<8x1xf32, #tpu.memory_space<vmem>>, vector<8x1xf32>
    %60 = vector.broadcast %59 : vector<8x1xf32> to vector<8x256xf32>
    %61 = arith.addf %58, %60 : vector<8x256xf32>
    %cst_21 = arith.constant 0.000000e+00 : f32
    %62 = vector.broadcast %cst_21 : f32 to vector<8x256xf32>
    %63 = arith.cmpf ogt, %61, %62 : vector<8x256xf32>
    %cst_22 = arith.constant 0.000000e+00 : f32
    %64 = vector.broadcast %cst_22 : f32 to vector<8x256xf32>
    %65 = arith.minimumf %61, %64 : vector<8x256xf32>
    %66 = math.exp %65 : vector<8x256xf32>
    %cst_23 = arith.constant 1.000000e+00 : f32
    %67 = vector.broadcast %cst_23 : f32 to vector<8x256xf32>
    %68 = arith.subf %66, %67 : vector<8x256xf32>
    %69 = arith.select %63, %61, %68 : vector<8x256xi1>, vector<8x256xf32>
    %c0_24 = arith.constant 0 : index
    %c0_25 = arith.constant 0 : index
    %c0_26 = arith.constant 0 : index
    %70 = vector.load %arg4[%c0_24, %c0_25, %c0_26] : memref<1x8x256xf32, #tpu.memory_space<vmem>>, vector<1x8x256xf32>
    %71 = vector.shape_cast %70 : vector<1x8x256xf32> to vector<8x256xf32>
    %72 = vector.shape_cast %69 : vector<8x256xf32> to vector<1x8x256xf32>
    tpu.vector_store %arg4[%c0_24, %c0_25, %c0_26], %72 {strides = array<i32>} : memref<1x8x256xf32, #tpu.memory_space<vmem>>, vector<1x8x256xf32>,
    return
  }
  func.func @transform_0(%arg0: i32) -> (i32, i32, i32) {
    %c0_i32 = arith.constant 0 : i32
    %c0_i32_0 = arith.constant 0 : i32
    %c0_i32_1 = arith.constant 0 : i32
    return %arg0, %c0_i32, %c0_i32_0 : i32, i32, i32
  }
  func.func @transform_1(%arg0: i32) -> (i32, i32) {
    %c0_i32 = arith.constant 0 : i32
    %c0_i32_0 = arith.constant 0 : i32
    %c0_i32_1 = arith.constant 0 : i32
    return %c0_i32, %c0_i32_0 : i32, i32
  }
  func.func @transform_2(%arg0: i32) -> (i32, i32) {
    %c0_i32 = arith.constant 0 : i32
    %c0_i32_0 = arith.constant 0 : i32
    %c0_i32_1 = arith.constant 0 : i32
    return %c0_i32, %c0_i32_0 : i32, i32
  }
  func.func @transform_3(%arg0: i32) -> (i32, i32, i32) {
    %c0_i32 = arith.constant 0 : i32
    %c0_i32_0 = arith.constant 0 : i32
    %c0_i32_1 = arith.constant 0 : i32
    return %arg0, %c0_i32, %c0_i32_0 : i32, i32, i32
  }
}

</mosaic_0001>

<bundles_post_ra>
// kernel: tpu_custom_call.1
= control target key start
LH: loop header
LB: loop body
LE: loop exit
PB: predicated region body
PF: predicated region fallthrough
CT: control target
= control target key end

     0   :  { %8 = vsyncpa [#allocation3], 0  ;;  %s1235_s0 = inlined_call_operand.hbm [shape: f32[2,16,290], index: 0, kind: input, shape index: {}]   ;;  %s1236_s1 = inlined_call_operand.hbm [shape: f32[8,144], index: 1, kind: input, shape index: {}]   ;;  %s1237_s2 = inlined_call_operand.vmem [shape: f32[8,1], index: 2, kind: input, shape index: {}]   ;;  %s1238_s3 = inlined_call_operand.hbm [shape: f32[2,8,256], index: 3, kind: output, shape index: {}]  }
   0x1   :  { %10 = vsyncpa [#allocation3 + $0x1], 0 }
   0x2   :  { %11 = vsyncpa [#allocation6], 0 }
   0x3   :  { %12 = vsyncpa [#allocation4], 0 }
   0x4   :  { %14 = vsyncpa [#allocation4 + $0x1], 0  ;;  %s957_s12 = smov 0   ;;  %s959_s13 = smov 0  }
   0x5   :  { %s961_s14 = smov 0   ;;  %s963_s15 = smov 0  }
   0x6 LB: > { %s978_s16 = sadd.s32 4294967295, %s923_s15   ;;  %s630_s17 = sadd.s32 4294967294, %s923_s15   ;;  %s923_s15 = sphi %s963_s15, %s1257_s15   ;;  %s919_s14 = sphi %s961_s14, %s1256_s14   ;;  %s915_s13 = sphi %s959_s13, %s1255_s13   ;;  %s911_s12 = sphi %s957_s12, %s1254_s12  }
   0x7   : > { %s982_s18 = sadd.s32 1, %s923_s15   ;;  %s27_s19 = sadd.s32 1, %s919_s14 }
   0x8   : > { %s24_s20 = ssub.s32 %s923_s15, %s982_s18  ;;  %p34_p0 = scmp.ne.s32.totalorder %s919_s14, %s915_s13 }
   0x9   : > { %p25_p1 = scmp.eq.s32.totalorder %s24_s20, 0  ;;  %p35_p2 = scmp.eq.s32.totalorder %s923_s15, 0 }
   0xa   : > { %p40_p3 = scmp.ne.s32.totalorder %s915_s13, %s911_s12  ;;  %p41_p4 = scmp.eq.s32.totalorder %s978_s16, 0 }
   0xb   : > { %s994_s21 = scalar_select %p25_p1, %s919_s14, %s27_s19  }
   0xc   : > { %p996_p5 = por %p35_p2, %p34_p0  ;;  %p1002_p6 = por %p41_p4, %p40_p3 }
   0xd   : > { %p106_p7 = scmp.eq.s32.totalorder %s978_s16, 1  ;;  %p112_p8 = scmp.eq.s32.totalorder %s630_s17, 1 }
   0xe   : > { %p631_p9 = scmp.ge.s32.totalorder %s923_s15, 1  ;;  %p119_p10 = scmp.lt.s32.totalorder %s923_s15, 3 }
   0xf   : > { %p1009_p11 = por %p106_p7, %p34_p0  ;;  %p1013_p12 = por %p112_p8, %p40_p3 }
  0x10   : > { %p1017_p13 = pnand %p631_p9, %p119_p10  ;;  %s131_s29 = sshll.u32 %s1236_s1, 4  ;;  %s132_s29 = int_to_ptr.hbm [resolvable:$true] %s131_s29 }
  0x11   : > { %s925_s30 = smov [#allocation5]   ;;  %p696_p3 = scmp.lt.s32.totalorder %s923_s15, 2 }
  0x12   : > { %p683_p1 = pneg %p1017_p13  ;;  %s133_s4 = sshll.u32 %s925_s30, 4  ;;  %s134_s4 = int_to_ptr.vmem [resolvable:$true] %s133_s4 }
  0x13   : > { %s147_s5 = sand.u32 1, %s919_s14   ;;  %p1033_p7 = pnand %p696_p3, %p996_p5 }
  0x14   : > { %p684_p2 = pnand %p683_p1, %p41_p4  ;;  %s672_s7 = smul.u32 48, %s147_s5 }
  0x15   : > { %s673_s8 = smul.u32 48, %s923_s15  ;;  %s148_s27 = scalar_lea.sflag [#allocation3], %s147_s5 }
  0x16   : > { %686 = dma.hbm_to_vmem [thread:$0]  (!%p684_p2), %s132_s29, 256, %s134_s4, [#allocation6]  }
  0x17   : > { %s156_s11 = scalar_lea.hbm %s1235_s0, %s673_s8  ;;  %s151_s17 = scalar_lea.vmem [#allocation2], %s672_s7 }
  0x18   : > { %s159_s19 = sshll.u32 %s151_s17, 4  ;;  %s157_s20 = sshll.u32 %s156_s11, 4  ;;  %s160_s19 = int_to_ptr.vmem [resolvable:$true] %s159_s19  ;;  %s158_s20 = int_to_ptr.hbm [resolvable:$true] %s157_s20 }
  0x19   : > { %s823_s28 = sshra.s32 %s158_s20, 4  ;;  %p827_p8 = pneg %p1033_p7  ;;  %s824_s28 = int_to_ptr.hbm [resolvable:$true] %s823_s28 }
  0x1a   : > { %s825_s22 = scalar_lea.hbm %s824_s28, 48  ;;  %s830_s4 = scalar_lea.hbm %s1235_s0, 96 }
  0x1b   : > { %p826_p5 = scmp.ne.s32.totalorder %s824_s28, %s825_s22  ;;  %p831_p1 = scmp.lt.s32.totalorder %s824_s28, %s1235_s0 }
  0x1c   : > { %p832_p2 = scmp.lt.s32.totalorder %s830_s4, %s825_s22 }
  0x1d   : > { %p828_p9 = pnand %p827_p8, %p826_p5 }
  0x1e   : > { %p833_p3 = por %p832_p2, %p831_p1 }
  0x1f   : > { %p829_p10 = pneg %p828_p9 }
  0x21   : > { %p834_p0 = pnand %p833_p3, %p829_p10 }
  0x23   : > { %837 = shalt.err (!%p834_p0)
}
  0x24   : > { %s926_s5 = smov 384   ;;  %s927_s7 = smov 24  }
  0x25   : > { %690 = dma.hbm_to_vmem [thread:$0]  (!%p1033_p7), %s158_s20, 768, %s160_s19, %s148_s27, %s926_s5, %s926_s5, %s927_s7  }
  0x26   : > { %171 = sbr.rel (%p1017_p13) target bundleno = 413 (0x19d), region = 32  ;;  %s1054_s10 = sand.u32 (!%p1017_p13), 1, %s915_s13  }
  0x27   : > { %s674_s11 = smul.u32 (!%p1017_p13), 48, %s1054_s10  ;;  %s174_s17 = scalar_lea.sflag (!%p1017_p13), [#allocation3], %s1054_s10 }
  0x29   : > { %s177_s28 = scalar_lea.vmem (!%p1017_p13), [#allocation2], %s674_s11 }
  0x2b   : > { %898 = dma.done.wait (%p1002_p6), %s174_s17, 768  }
  0x2c   : > { %900 = vsyncadd (%p1002_p6), %s174_s17, 4294966528 }
  0x2d   : > { %902 = dma.done.wait (%p41_p4), [#allocation6], 256  }
  0x2e   : > { %904 = vsyncadd (%p41_p4), [#allocation6], 4294967040  ;;  %v1066_v0 = vld [vmem:[%s177_s28 + $0x20] sm:$0xff]  ;;  %v211_v1 = vld [vmem:[%s177_s28 + $0x28] sm:$0xff]  ;;  %s928_s26 = smov 96   ;;  %s929_s23 = smov 95   ;;  %v212_v11 = vlaneseq }
  0x2f   : > { %v1068_v2 = vld [vmem:[%s177_s28 + $0x8] sm:$0xff]  ;;  %322 = vrot.lane.b32.xlu1 %v1066_v0, %s928_s26  ;;  %v743_v3 = vpack.i.bf16 %v211_v1, %v1066_v0  ;;  %v208_v4 = vld [vmem:[%s177_s28 + $0x10] sm:$0xff]  ;;  %v1074_v6 = vld [vmem:[%s177_s28] sm:$0xff]  ;;  %s930_s6 = smov 110   ;;  %s931_s19 = smov 111   ;;  %vm418_vm0 = vcmask 777216  }
  0x30   : > { %316 = vrot.lane.b32.xlu2 %v1068_v2, %s928_s26  ;;  %v748_v5 = vpack.i.bf16 %v208_v4, %v1068_v2  ;;  %v1076_v7 = vld [vmem:[%s177_s28 + $0x18] sm:$0xff]  ;;  %s932_s20 = smov 112   ;;  %s933_s27 = smov 126   ;;  %v213_v14 = vand.u32 127, %v212_v11  ;;  %vm326_vm2 = vcmask 785408   ;;  %vm301_vm3 = vcmask 900096  }
  0x31   : > { %744 = vrot.lane.b32.xlu0 %v743_v3, %s929_s23  ;;  %v753_v8 = vpack.i.bf16 %v1074_v6, %v1076_v7  ;;  %s934_s22 = smov 127   ;;  %s935_s29 = smov 94   ;;  %vm397_vm6 = vcmask 908288   ;;  %vm276_vm8 = vcmask 916480   ;;  %vm251_vm9 = vcmask 1031168  }
  0x32   : > { %v214_v19 = vadd.s32 128, %v213_v14  ;;  %v215_v36 = vand.u32 15, %v213_v14  ;;  %vm376_vm10 = vcmask 1039360   ;;  %vm351_vm11 = vcmask 769024   ;;  %s637_s9 = sshll.u32 %s1054_s10, 4  ;;  %s671_s8 = sshll.u32 %s978_s16, 4 }
  0x33   : > { %vm435_vm12 = vcmask 130048   ;;  %s545_s11 = scalar_lea.hbm %s1238_s3, %s671_s8  ;;  %s205_s17 = scalar_lea.vmem [#allocation7], %s637_s9 }
  0x34   : > { %v216_v21 = vand.u32 15, %v214_v19  ;;  %vm1119_vm5 = vcmp.ge.s32.totalorder %v215_v36, 1  ;;  %vm1130_vm7 = vcmp.lt.s32.totalorder %v215_v36, 15  ;;  %v429_v19 = vld [vmem:[%s1237_s2] sm:$0xff]  ;;  %s547_s28 = sshll.u32 %s205_s17, 4  ;;  %s534_s16 = scalar_lea.sflag [#allocation4], %s1054_s10  ;;  %s548_s28 = int_to_ptr.vmem [resolvable:$true] %s547_s28 }
  0x36   : > { %vm1100_vm1 = vcmp.ge.s32.totalorder %v216_v21, 1  ;;  %vm1108_vm4 = vcmp.lt.s32.totalorder %v216_v21, 15 }
  0x37   : > { %324 = vrot.lane.b32.xlu1 %v211_v1, %s928_s26 }
  0x38   : > { %318 = vrot.lane.b32.xlu2 %v208_v4, %s928_s26 }
  0x39   : > { %749 = vrot.lane.b32.xlu0 %v748_v5, %s929_s23 }
  0x3f   : > { %297 = vrot.lane.b32.xlu1 %v1066_v0, %s930_s6 }
  0x40   : > { %299 = vrot.lane.b32.xlu2 %v211_v1, %s930_s6 }
  0x41   : > { %754 = vrot.lane.b32.xlu0 %v753_v8, %s929_s23 }
  0x47   : > { %293 = vrot.lane.b32.xlu1 %v208_v4, %s930_s6 }
  0x48   : > { %320 = vrot.lane.b32.xlu2 %v1076_v7, %s928_s26 }
  0x49   : > { %291 = vrot.lane.b32.xlu0 %v1068_v2, %s930_s6 }
  0x4f   : > { %759 = vrot.lane.b32.xlu1 %v743_v3, %s931_s19 }
  0x50   : > { %295 = vrot.lane.b32.xlu2 %v1076_v7, %s930_s6 }
  0x51   : > { %314 = vrot.lane.b32.xlu0 %v1074_v6, %s928_s26  ;;  %s549_s26 = sshll.u32 %s545_s11, 4  ;;  %s550_s26 = int_to_ptr.hbm [resolvable:$true] %s549_s26 }
  0x52   : > { %s867_s23 = sshra.s32 %s550_s26, 4  ;;  %s868_s23 = int_to_ptr.hbm [resolvable:$true] %s867_s23 }
  0x53   : > { %p874_p0 = scmp.lt.s32.totalorder %s868_s23, %s1238_s3 }
  0x57   : > { %272 = vrot.lane.b32.xlu1 %v1066_v0, %s932_s20 }
  0x58   : > { %274 = vrot.lane.b32.xlu2 %v211_v1, %s932_s20 }
  0x59   : > { %764 = vrot.lane.b32.xlu0 %v748_v5, %s931_s19 }
  0x5f   : > { %266 = vrot.lane.b32.xlu1 %v1068_v2, %s932_s20 }
  0x60   : > { %268 = vrot.lane.b32.xlu2 %v208_v4, %s932_s20 }
  0x61   : > { %289 = vrot.lane.b32.xlu0 %v1074_v6, %s930_s6  ;;  %s869_s6 = scalar_lea.hbm %s868_s23, 16 }
  0x62   : > { %p870_p4 = scmp.ne.s32.totalorder %s868_s23, %s869_s6 }
  0x64   : > { %p871_p6 = pnand %p870_p4, %p1009_p11 }
  0x66   : > { %p872_p13 = pneg %p871_p6 }
  0x67   : > { %247 = vrot.lane.b32.xlu1 %v1066_v0, %s933_s27 }
  0x68   : > { %249 = vrot.lane.b32.xlu2 %v211_v1, %s933_s27 }
  0x69   : > { %769 = vrot.lane.b32.xlu0 %v753_v8, %s931_s19 }
  0x6f   : > { %243 = vrot.lane.b32.xlu1 %v208_v4, %s933_s27 }
  0x70   : > { %270 = vrot.lane.b32.xlu2 %v1076_v7, %s932_s20 }
  0x71   : > { %241 = vrot.lane.b32.xlu0 %v1068_v2, %s933_s27 }
  0x77   : > { %774 = vrot.lane.b32.xlu1 %v743_v3, %s934_s22 }
  0x78   : > { %245 = vrot.lane.b32.xlu2 %v1076_v7, %s933_s27 }
  0x79   : > { %264 = vrot.lane.b32.xlu0 %v1074_v6, %s932_s20 }
  0x7f   : > { %239 = vrot.lane.b32.xlu1 %v1074_v6, %s933_s27  ;;  %s873_s27 = scalar_lea.hbm %s1238_s3, 32 }
  0x80   : > { %347 = vrot.lane.b32.xlu2 %v1066_v0, %s935_s29  ;;  %p875_p7 = scmp.lt.s32.totalorder %s873_s27, %s869_s6 }
  0x81   : > { %779 = vrot.lane.b32.xlu0 %v748_v5, %s934_s22 }
  0x82   : > { %p876_p5 = por %p875_p7, %p874_p0 }
  0x84   : > { %p877_p8 = pnand %p876_p5, %p872_p13 }
  0x87   : > { %784 = vrot.lane.b32.xlu1 %v753_v8, %s934_s22 }
  0x88   : > { %341 = vrot.lane.b32.xlu2 %v1068_v2, %s935_s29 }
  0x89   : > { %349 = vrot.lane.b32.xlu0 %v211_v1, %s935_s29 }
  0x8a   : > { %v317_v9 = vpop.permute.xlu2 %316 }
  0x8f   : > { %345 = vrot.lane.b32.xlu1 %v1076_v7, %s935_s29 }
  0x90   : > { %339 = vrot.lane.b32.xlu2 %v1074_v6, %s935_s29 }
  0x91   : > { %343 = vrot.lane.b32.xlu0 %v208_v4, %s935_s29 }
  0x92   : > { %v319_v10 = vpop.permute.xlu2 %318 }
  0x93   : > { %v328_v30 = vsel %vm326_vm2, %v317_v9, %v319_v10 }
  0x9a   : > { %v300_v12 = vpop.permute.xlu2 %299 }
  0xa1   : > { %v323_v13 = vpop.permute.xlu1 %322 }
  0xa2   : > { %v321_v22 = vpop.permute.xlu2 %320 }
  0xa3   : > { %v745_v15 = vpop.permute.xlu0 %744  ;;  %v329_v42 = vsel %vm326_vm2, %v321_v22, %v323_v13 }
  0xa4   : > { %v747_v16 = vunpack.i.h.bf16 %v745_v15  ;;  %v746_v17 = vunpack.i.l.bf16 %v745_v15 }
  0xa6   : > { %v422_v18 = vsel %vm418_vm0, %v746_v17, %v747_v16 }
  0xa7   : > { %479 = vmatpush.msra.mxu2 %v422_v18 }
  0xa9   : > { %v325_v20 = vpop.permute.xlu1 %324 }
  0xaa   : > { %v330_v28 = vsel %vm326_vm2, %v323_v13, %v325_v20  ;;  %v296_v37 = vpop.permute.xlu2 %295  ;;  %v936_v20 = vmov 0  }
  0xab   : > { %v750_v23 = vpop.permute.xlu0 %749  ;;  %788 = vset.pattern.permute.xlu0 %v936_v20 }
  0xac   : > { %v752_v24 = vunpack.i.h.bf16 %v750_v23  ;;  %v751_v25 = vunpack.i.l.bf16 %v750_v23  ;;  %432 = vperm.xlu0 %788, %v429_v19  }
  0xae   : > { %v420_v26 = vsel %vm418_vm0, %v751_v25, %v752_v24 }
  0xaf   : > { %480 = vmatpush.msra.mxu2 %v420_v26 }
  0xb1   : > { %v298_v29 = vpop.permute.xlu1 %297  ;;  %651 = vmatpush.msk.msra.mxu2 %vm1100_vm1, %v330_v28 }
  0xb2   : > { %v305_v32 = vsel %vm301_vm3, %v298_v29, %v300_v12  ;;  %v275_v45 = vpop.permute.xlu2 %274  ;;  %v304_v53 = vsel %vm301_vm3, %v296_v37, %v298_v29 }
  0xb3   : > { %652 = vmatpush.msk.msra.mxu2 %vm1100_vm1, %v328_v30  ;;  %v755_v33 = vpop.permute.xlu0 %754 }
  0xb4   : > { %v757_v34 = vunpack.i.h.bf16 %v755_v33  ;;  %v756_v35 = vunpack.i.l.bf16 %v755_v33 }
  0xb5   : > { %653 = vmatpush.msk.msra.mxu2 %vm1108_vm4, %v305_v32 }
  0xb6   : > { %v421_v38 = vsel %vm418_vm0, %v756_v35, %v746_v17  ;;  %v419_v39 = vsel %vm418_vm0, %v757_v34, %v751_v25 }
  0xb7   : > { %439 = vmatpush.msra.mxu0 %v421_v38 }
  0xb9   : > { %v294_v41 = vpop.permute.xlu1 %293  ;;  %440 = vmatpush.msra.mxu0 %v419_v39  ;;  %v427_v39 = vld [vmem:[#allocation5] sm:$0xff] }
  0xba   : > { %v269_v54 = vpop.permute.xlu2 %268 }
  0xbb   : > { %v292_v43 = vpop.permute.xlu0 %291  ;;  %638 = vmatpush.msk.msra.mxu0 %vm1119_vm5, %v329_v42 }
  0xbc   : > { %v303_v44 = vsel %vm301_vm3, %v292_v43, %v294_v41 }
  0xbd   : > { %654 = vmatpush.msk.msra.mxu2 %vm1108_vm4, %v303_v44 }
  0xc1   : > { %v760_v46 = vpop.permute.xlu1 %759 }
  0xc2   : > { %v762_v47 = vunpack.i.h.bf16 %v760_v46  ;;  %v761_v48 = vunpack.i.l.bf16 %v760_v46  ;;  %v250_v63 = vpop.permute.xlu2 %249 }
  0xc3   : > { %v315_v49 = vpop.permute.xlu0 %314 }
  0xc4   : > { %v327_v50 = vsel %vm326_vm2, %v315_v49, %v317_v9  ;;  %v401_v52 = vsel %vm397_vm6, %v761_v48, %v762_v47 }
  0xc5   : > { %639 = vmatpush.msk.msra.mxu0 %vm1119_vm5, %v327_v50  ;;  %485 = vmatpush.msra.mxu2 %v401_v52 }
  0xc7   : > { %640 = vmatpush.msk.msra.mxu0 %vm1130_vm7, %v304_v53 }
  0xc9   : > { %v273_v55 = vpop.permute.xlu1 %272 }
  0xca   : > { %v280_v60 = vsel %vm276_vm8, %v273_v55, %v275_v45  ;;  %v271_v11 = vpop.permute.xlu2 %270 }
  0xcb   : > { %v765_v56 = vpop.permute.xlu0 %764  ;;  %v279_v15 = vsel %vm276_vm8, %v271_v11, %v273_v55 }
  0xcc   : > { %v767_v57 = vunpack.i.h.bf16 %v765_v56  ;;  %v766_v58 = vunpack.i.l.bf16 %v765_v56 }
  0xce   : > { %v399_v59 = vsel %vm397_vm6, %v766_v58, %v767_v57 }
  0xcf   : > { %486 = vmatpush.msra.mxu2 %v399_v59 }
  0xd1   : > { %v267_v61 = vpop.permute.xlu1 %266  ;;  %655 = vmatpush.msk.msra.mxu2 %vm1100_vm1, %v280_v60 }
  0xd2   : > { %v278_v62 = vsel %vm276_vm8, %v267_v61, %v269_v54  ;;  %v246_v18 = vpop.permute.xlu2 %245 }
  0xd3   : > { %v290_v1 = vpop.permute.xlu0 %289  ;;  %656 = vmatpush.msk.msra.mxu2 %vm1100_vm1, %v278_v62 }
  0xd4   : > { %v302_v3 = vsel %vm301_vm3, %v290_v1, %v292_v43 }
  0xd5   : > { %641 = vmatpush.msk.msra.mxu0 %vm1130_vm7, %v302_v3 }
  0xd9   : > { %v248_v4 = vpop.permute.xlu1 %247 }
  0xda   : > { %v255_v5 = vsel %vm251_vm9, %v248_v4, %v250_v63  ;;  %v348_v28 = vpop.permute.xlu2 %347  ;;  %v254_v29 = vsel %vm251_vm9, %v246_v18, %v248_v4 }
  0xdb   : > { %v770_v8 = vpop.permute.xlu0 %769  ;;  %657 = vmatpush.msk.msra.mxu2 %vm1108_vm4, %v255_v5 }
  0xdc   : > { %v772_v9 = vunpack.i.h.bf16 %v770_v8  ;;  %v771_v10 = vunpack.i.l.bf16 %v770_v8 }
  0xde   : > { %v400_v12 = vsel %vm397_vm6, %v771_v10, %v761_v48  ;;  %v398_v13 = vsel %vm397_vm6, %v772_v9, %v766_v58  ;;  %v428_v48 = vld [vmem:[#allocation5 + $0x8] sm:$0xff] }
  0xdf   : > { %445 = vmatpush.msra.mxu0 %v400_v12 }
  0xe1   : > { %v244_v14 = vpop.permute.xlu1 %243  ;;  %446 = vmatpush.msra.mxu0 %v398_v13 }
  0xe2   : > { %v342_v37 = vpop.permute.xlu2 %341 }
  0xe3   : > { %v242_v16 = vpop.permute.xlu0 %241  ;;  %642 = vmatpush.msk.msra.mxu0 %vm1119_vm5, %v279_v15 }
  0xe4   : > { %v253_v17 = vsel %vm251_vm9, %v242_v16, %v244_v14 }
  0xe5   : > { %658 = vmatpush.msk.msra.mxu2 %vm1108_vm4, %v253_v17 }
  0xe9   : > { %v775_v21 = vpop.permute.xlu1 %774 }
  0xea   : > { %v777_v22 = vunpack.i.h.bf16 %v775_v21  ;;  %v776_v23 = vunpack.i.l.bf16 %v775_v21 }
  0xeb   : > { %v265_v24 = vpop.permute.xlu0 %264 }
  0xec   : > { %v277_v25 = vsel %vm276_vm8, %v265_v24, %v267_v61  ;;  %v380_v26 = vsel %vm376_vm10, %v776_v23, %v777_v22 }
  0xed   : > { %643 = vmatpush.msk.msra.mxu0 %vm1119_vm5, %v277_v25  ;;  %491 = vmatpush.msra.mxu2 %v380_v26 }
  0xef   : > { %644 = vmatpush.msk.msra.mxu0 %vm1130_vm7, %v254_v29 }
  0xf1   : > { %v240_v30 = vpop.permute.xlu1 %239 }
  0xf2   : > { %v252_v32 = vsel %vm251_vm9, %v240_v30, %v242_v16 }
  0xf3   : > { %v780_v33 = vpop.permute.xlu0 %779  ;;  %645 = vmatpush.msk.msra.mxu0 %vm1130_vm7, %v252_v32 }
  0xf4   : > { %v782_v34 = vunpack.i.h.bf16 %v780_v33  ;;  %v781_v35 = vunpack.i.l.bf16 %v780_v33 }
  0xf6   : > { %v378_v36 = vsel %vm376_vm10, %v781_v35, %v782_v34 }
  0xf7   : > { %492 = vmatpush.msra.mxu2 %v378_v36 }
  0xf9   : > { %v785_v38 = vpop.permute.xlu1 %784  ;;  %659 = vmatpush.msk.msra.mxu2 %vm1100_vm1, %v1066_v0  ;;  %v340_v0 = vpop.permute.xlu2 %339 }
  0xfa   : > { %v787_v41 = vunpack.i.h.bf16 %v785_v38  ;;  %v786_v42 = vunpack.i.l.bf16 %v785_v38  ;;  %v352_v49 = vsel %vm351_vm11, %v340_v0, %v342_v37 }
  0xfb   : > { %v350_v43 = vpop.permute.xlu0 %349  ;;  %660 = vmatpush.msk.msra.mxu2 %vm1100_vm1, %v1068_v2 }
  0xfc   : > { %v379_v44 = vsel %vm376_vm10, %v786_v42, %v776_v23  ;;  %v355_v45 = vsel %vm351_vm11, %v348_v28, %v350_v43  ;;  %495 = vmatmul.f32.vlgmr.msra.gmra.mxu2 %v427_v39  ;;  %v377_v46 = vsel %vm376_vm10, %v787_v41, %v781_v35 }
  0xfd   : > { %451 = vmatpush.msra.mxu0 %v379_v44  ;;  %661 = vmatpush.msk.msra.mxu3 %vm1108_vm4, %v355_v45 }
  0xff   : > { %452 = vmatpush.msra.mxu0 %v377_v46 }
 0x101   : > { %v346_v47 = vpop.permute.xlu1 %345  ;;  %646 = vmatpush.msk.msra.mxu0 %vm1119_vm5, %v1076_v7 }
 0x102   : > { %v354_v2 = vsel %vm351_vm11, %v346_v47, %v348_v28 }
 0x103   : > { %648 = vmatpush.msk.msra.mxu1 %vm1130_vm7, %v354_v2  ;;  %v344_v27 = vpop.permute.xlu0 %343  ;;  %647 = vmatpush.msk.msra.mxu0 %vm1119_vm5, %v1074_v6 }
 0x104   : > { %455 = vmatmul.f32.vlgmr.msra.gmra.mxu0 %v427_v39  ;;  %v353_v50 = vsel %vm351_vm11, %v342_v37, %v344_v27 }
 0x105   : > { %649 = vmatpush.msk.msra.mxu1 %vm1130_vm7, %v352_v49  ;;  %662 = vmatpush.msk.msra.mxu3 %vm1108_vm4, %v353_v50 }
 0x106   : > { %650 = vmatmul.msk.f32.vlgmr.msra.gmra.mxu1 %vm435_vm12, %v428_v48  ;;  %663 = vmatmul.msk.f32.vlgmr.msra.gmra.mxu3 %vm435_vm12, %v428_v48 }
 0x11e   : > { %v433_v7 = vpop.permute.xlu0 %432 }
 0x17f   : > { %v496_v53 = vpop.f32.mrf.mxu2 }
 0x180   : > { %v497_v56 = vadd.f32 %v496_v53, %v433_v7 }
 0x181   : > { %v456_v40 = vpop.f32.mrf.mxu0 }
 0x182   : > { %v457_v6 = vadd.f32 %v456_v40, %v433_v7 }
 0x183   : > { %v476_v52 = vpop.f32.mrf.mxu1 }
 0x184   : > { %v477_v54 = vadd.f32 %v476_v52, %v457_v6 }
 0x186   : > { %v521_v55 = vmin.f32 %v477_v54, 0.0  ;;  %vm519_vm13 = vcmp.gt.f32.partialorder %v477_v54, 0.0 }
 0x188   : > { %v523_v57 = vmul.f32 1.442695, %v521_v55 }
 0x189   : > { %v516_v58 = vpop.f32.mrf.mxu3 }
 0x18a   : > { %789 = vpow2.f32 %v523_v57  ;;  %v517_v51 = vadd.f32 %v516_v58, %v497_v56 }
 0x18c   : > { %v522_v59 = vmin.f32 %v517_v51, 0.0  ;;  %vm520_vm14 = vcmp.gt.f32.partialorder %v517_v51, 0.0 }
 0x18e   : > { %v525_v31 = vmul.f32 1.442695, %v522_v59 }
 0x190   : > { %v790_v60 = vpop.eup %789  ;;  %791 = vpow2.f32 %v525_v31 }
 0x191   : > { %v664_v61 = vadd.f32 -1.0, %v790_v60 }
 0x193   : > { %v529_v62 = vsel %vm519_vm13, %v477_v54, %v664_v61 }
 0x194   : > { %531 = vst [vmem:[%s205_s17] sm:$0xff] %v529_v62 }
 0x196   : > { %v792_v63 = vpop.eup %791 }
 0x197   : > { %v665_v1 = vadd.f32 -1.0, %v792_v63 }
 0x199   : > { %v530_v3 = vsel %vm520_vm14, %v517_v51, %v665_v1 }
 0x19a   : > { %532 = vst [vmem:[%s205_s17 + $0x8] sm:$0xff] %v530_v3 }
 0x19b   : > { %880 = shalt.err (!%p877_p8)
}
 0x19c   : > { %681 = dma.vmem_to_hbm [thread:$0]  (%p1009_p11), %s548_s28, 256, %s550_s26, %s534_s16  }
 0x19d PF: > { %s561_s10 = sand.u32 1, %s911_s12   ;;  %p1253_p9 = scmp.ge.s32.totalorder %s923_s15, 2 }
 0x19e   : > { %s562_s30 = scalar_lea.sflag [#allocation4], %s561_s10 }
 0x19f   : > { %p692_p10 = pnand %p1253_p9, %p1013_p12 }
 0x1a1   : > { %p693_p1 = pneg %p692_p10 }
 0x1a3   : > { %906 = dma.done.wait (%p693_p1), %s562_s30, 256  }
 0x1a4   : > { %908 = vsyncadd (%p693_p1), %s562_s30, 4294967040  ;;  %p17_p2 = scmp.ge.s32.totalorder %s982_s18, 4   ;;  %s1254_s12 = smov %s915_s13 }
 0x1a5   : > { %s1255_s13 = smov %s919_s14  ;;  %s1256_s14 = smov %s994_s21 }
 0x1a6   : > { %s1257_s15 = smov %s982_s18  ;;  %19 = sbr.rel (!%p17_p2) target bundleno = 6 (0x6), region = 81 }
 0x1ab   :  { %568 = vsyncpa [#allocation3], 1 }
 0x1ac   :  { %570 = vsyncpa [#allocation3 + $0x1], 1 }
 0x1ad   :  { %571 = vsyncpa [#allocation6], 1 }
 0x1ae   :  { %572 = vsyncpa [#allocation4], 1 }
 0x1af   :  { %574 = vsyncpa [#allocation4 + $0x1], 1 }

</bundles_post_ra>
